<compile_context>
chip_gen: v7x
topology: tpu7x:2x2x1
jax: 0.10.0
libtpu: 0.0.40
codegen_flags: <defaults>
</compile_context>

<pallas_src>
import functools

import jax
import jax.numpy as jnp
import numpy as np
from jax.experimental import pallas as pl
from jax.experimental.pallas import tpu as pltpu


def _embed_kernel(x_ref, w_ref, add_ref, o_ref):
    # x_ref:   (TT, K)  bf16 patch rows for this (batch, token-tile) grid point
    #                   (row 0 of each batch is zeros -> becomes the cls slot)
    # w_ref:   (K, N)   bf16 patch-embedding weight, resident across the grid
    # add_ref: (TT, N)  f32 per-token additive term (bias+pos, or cls+pos[0])
    # o_ref:   (TT, N)  f32 output tile
    y = jnp.dot(x_ref[...], w_ref[...], preferred_element_type=jnp.float32)
    o_ref[...] = (y + add_ref[...]).astype(o_ref.dtype)


def _extract_patches_nchw(x, patch_size):
    """(B, C, H, W) -> (B, num_patches, C*p*p), patch flattened as (C, kh, kw)."""
    B, C, H, W = x.shape
    p = patch_size
    gh, gw = H // p, W // p
    x = x.reshape(B, C, gh, p, gw, p)
    x = jnp.transpose(x, (0, 2, 4, 1, 3, 5))  # (B, gh, gw, C, p, p)
    return x.reshape(B, gh * gw, C * p * p)


def vit_embedding_forward(x_nchw, conv_weight, conv_bias, pos_embedding, cls_token,
                          patch_size, *, compute_dtype=jnp.bfloat16,
                          max_token_tile=512):
    """Forward pass equivalent to ViTEmbedding(cls_type='token').forward.

    x_nchw:        (B, C, H, W)               float32
    conv_weight:   (hidden, C, p, p)          OIHW, as in nn.Conv2d
    conv_bias:     (hidden,)
    pos_embedding: (1, num_patches + 1, hidden)
    cls_token:     (1, 1, hidden)
    returns:       (B, num_patches + 1, hidden) float32
    """
    B, C, H, W = x_nchw.shape
    hidden = conv_weight.shape[0]
    p = patch_size
    num_patches = (H // p) * (W // p)
    T = num_patches + 1                       # tokens incl. cls
    K = C * p * p

    # TODO(synk): the NCHW patch unfold (reshape+transpose) is still XLA glue that
    # materializes the patch tensor in HBM; folding it into the kernel's DMA would
    # require in-kernel minor-dim transposes.
    patches = _extract_patches_nchw(x_nchw, p).astype(compute_dtype)      # (B, P, K)
    # Prepend one zero row per batch: zeros @ W == 0, so the cls value rides purely
    # in the per-token add term and the kernel writes the full (B, T, N) output
    # (no jnp.concatenate over the output afterwards).
    patches = jnp.pad(patches, ((0, 0), (1, 0), (0, 0)))                  # (B, T, K)

    w_mat = conv_weight.reshape(hidden, K).T.astype(compute_dtype)        # (K, N)

    # Per-token additive term in f32:
    #   row 0      = cls_token + pos[0]
    #   rows 1..T  = conv_bias + pos[t]
    add_term = pos_embedding[0].astype(jnp.float32)                       # (T, N)
    add_term = add_term.at[0].add(cls_token[0, 0].astype(jnp.float32))
    add_term = add_term.at[1:].add(conv_bias.astype(jnp.float32)[None, :])

    # Token tile: full T when small, else an MXU/sublane-friendly 256-row tile.
    # (For real ViT hidden=768 the last dim is lane-dense automatically; the toy
    #  hidden=32 uses the full-dim exception of the (8,128) rule.)
    tile_t = T if T <= max_token_tile else 256
    n_tok_blocks = pl.cdiv(T, tile_t)

    in_itemsize = jnp.dtype(compute_dtype).itemsize
    block_bytes = (
        2 * tile_t * K * in_itemsize          # double-buffered patch tiles
        + 2 * tile_t * hidden * 4             # double-buffered output tiles (f32)
        + 2 * tile_t * hidden * 4             # double-buffered add-term tiles (f32)
        + K * hidden * in_itemsize            # resident weight
    )
    vmem_limit = int(min(100 * 2 ** 20, max(8 * 2 ** 20, 2 * block_bytes)))

    out = pl.pallas_call(
        _embed_kernel,
        out_shape=jax.ShapeDtypeStruct((B, T, hidden), jnp.float32),
        grid_spec=pltpu.PrefetchScalarGridSpec(
            num_scalar_prefetch=0,
            grid=(B, n_tok_blocks),
            in_specs=[
                # patch rows: one batch, one token tile per grid point
                pl.BlockSpec((None, tile_t, K), lambda b, j: (b, j, 0)),
                # weight: whole matrix, resident across the grid
                pl.BlockSpec((K, hidden), lambda b, j: (0, 0)),
                # per-token add term: follows the token tile
                pl.BlockSpec((tile_t, hidden), lambda b, j: (j, 0)),
            ],
            out_specs=pl.BlockSpec((None, tile_t, hidden), lambda b, j: (b, j, 0)),
        ),
        compiler_params=pltpu.CompilerParams(
            dimension_semantics=("parallel", "parallel"),
            vmem_limit_bytes=vmem_limit,
        ),
    )(patches, w_mat, add_term)

    # Dropout(p=0.0) is the identity.
    return out


def _reference_forward(x_nchw, conv_weight, conv_bias, pos_embedding, cls_token,
                       patch_size):
    """Pure-JAX f32 reference mirroring the PyTorch module (for validation)."""
    y = jax.lax.conv_general_dilated(
        x_nchw, conv_weight,
        window_strides=(patch_size, patch_size),
        padding="VALID",
        dimension_numbers=("NCHW", "OIHW", "NCHW"),
    ) + conv_bias[None, :, None, None]
    B, N, gh, gw = y.shape
    y = y.reshape(B, N, gh * gw).transpose(0, 2, 1)               # (B, P, N)
    cls = jnp.broadcast_to(cls_token, (B, 1, N))
    y = jnp.concatenate([cls, y], axis=1)
    return y + pos_embedding


if __name__ == "__main__":
    # Small config: image 16x16, patch 4, hidden 32, 4 input channels, batch 2.
    image_size, patch_size, hidden_dim, in_channel, B = 16, 4, 32, 4, 2
    num_patches = (image_size // patch_size) ** 2

    key = jax.random.PRNGKey(0)
    k_x, k_w, k_b, k_pos = jax.random.split(key, 4)

    x = jax.random.normal(k_x, (B, in_channel, image_size, image_size), jnp.float32)
    conv_weight = jax.random.normal(
        k_w, (hidden_dim, in_channel, patch_size, patch_size), jnp.float32) * 0.05
    conv_bias = jax.random.normal(k_b, (hidden_dim,), jnp.float32) * 0.05
    pos_embedding = jax.random.normal(
        k_pos, (1, num_patches + 1, hidden_dim), jnp.float32)
    cls_token = jnp.zeros((1, 1, hidden_dim), jnp.float32)  # nn.Parameter(torch.zeros)

    fwd = jax.jit(functools.partial(vit_embedding_forward, patch_size=patch_size))
    out = jax.block_until_ready(fwd(x, conv_weight, conv_bias, pos_embedding, cls_token))

    ref = _reference_forward(x, conv_weight, conv_bias, pos_embedding, cls_token,
                             patch_size)
    assert out.shape == (B, num_patches + 1, hidden_dim), out.shape
    # bf16 MXU inputs (f32 accumulate) vs f32 conv reference -> loosened tolerance.
    err = np.max(np.abs(np.asarray(out) - np.asarray(ref)))
    assert np.allclose(np.asarray(out), np.asarray(ref), rtol=2e-2, atol=2e-2), err

    print("KERNEL_OK")
</pallas_src>

<mosaic_0001>
module attributes {stable_mosaic.version = 11 : i64} {
  func.func @_embed_kernel(%arg0: i32, %arg1: i32, %arg2: memref<1x17x64xbf16, #tpu.memory_space<vmem>>, %arg3: memref<64x32xbf16, #tpu.memory_space<vmem>>, %arg4: memref<17x32xf32, #tpu.memory_space<vmem>>, %arg5: memref<1x17x32xf32, #tpu.memory_space<vmem>>) attributes {dimension_semantics = [#tpu.dimension_semantics<parallel>, #tpu.dimension_semantics<parallel>], iteration_bounds = array<i64: 2, 1>, scalar_prefetch = 0 : i64, scratch_operands = 0 : i64, tpu.core_type = #tpu.core_type<tc>, window_params = [{transform_indices = @transform_0, window_bounds = array<i64: 1, 17, 64>}, {pipeline_mode = #tpu.pipeline_mode<synchronous>, transform_indices = @transform_1, window_bounds = array<i64: 64, 32>}, {transform_indices = @transform_2, window_bounds = array<i64: 17, 32>}, {transform_indices = @transform_3, window_bounds = array<i64: 1, 17, 32>}]} {
    %c0 = arith.constant 0 : index
    %c0_0 = arith.constant 0 : index
    %c0_1 = arith.constant 0 : index
    %0 = vector.load %arg2[%c0, %c0_0, %c0_1] : memref<1x17x64xbf16, #tpu.memory_space<vmem>>, vector<1x17x64xbf16>
    %1 = vector.shape_cast %0 : vector<1x17x64xbf16> to vector<17x64xbf16>
    %c0_2 = arith.constant 0 : index
    %c0_3 = arith.constant 0 : index
    %2 = vector.load %arg3[%c0_2, %c0_3] : memref<64x32xbf16, #tpu.memory_space<vmem>>, vector<64x32xbf16>
    %cst = arith.constant dense<0.000000e+00> : vector<17x32xf32>
    %3 = tpu.matmul %1, %2, %cst {dimension_numbers = #tpu.dot_dimension_numbers<[1], [0], [0], [1], [0, 0, 1, 1], [], []>} : vector<17x64xbf16>, vector<64x32xbf16>, vector<17x32xf32> -> vector<17x32xf32>
    %c0_4 = arith.constant 0 : index
    %c0_5 = arith.constant 0 : index
    %4 = vector.load %arg4[%c0_4, %c0_5] : memref<17x32xf32, #tpu.memory_space<vmem>>, vector<17x32xf32>
    %5 = arith.addf %3, %4 : vector<17x32xf32>
    %c0_6 = arith.constant 0 : index
    %c0_7 = arith.constant 0 : index
    %c0_8 = arith.constant 0 : index
    %6 = vector.load %arg5[%c0_6, %c0_7, %c0_8] : memref<1x17x32xf32, #tpu.memory_space<vmem>>, vector<1x17x32xf32>
    %7 = vector.shape_cast %6 : vector<1x17x32xf32> to vector<17x32xf32>
    %8 = vector.shape_cast %5 : vector<17x32xf32> to vector<1x17x32xf32>
    tpu.vector_store %arg5[%c0_6, %c0_7, %c0_8], %8 {strides = array<i32>} : memref<1x17x32xf32, #tpu.memory_space<vmem>>, vector<1x17x32xf32>,
    return
  }
  func.func @transform_0(%arg0: i32, %arg1: i32) -> (i32, i32, i32) {
    %c0_i32 = arith.constant 0 : i32
    %c0_i32_0 = arith.constant 0 : i32
    return %arg0, %arg1, %c0_i32 : i32, i32, i32
  }
  func.func @transform_1(%arg0: i32, %arg1: i32) -> (i32, i32) {
    %c0_i32 = arith.constant 0 : i32
    %c0_i32_0 = arith.constant 0 : i32
    %c0_i32_1 = arith.constant 0 : i32
    return %c0_i32, %c0_i32_0 : i32, i32
  }
  func.func @transform_2(%arg0: i32, %arg1: i32) -> (i32, i32) {
    %c0_i32 = arith.constant 0 : i32
    %c0_i32_0 = arith.constant 0 : i32
    return %arg1, %c0_i32 : i32, i32
  }
  func.func @transform_3(%arg0: i32, %arg1: i32) -> (i32, i32, i32) {
    %c0_i32 = arith.constant 0 : i32
    %c0_i32_0 = arith.constant 0 : i32
    return %arg0, %arg1, %c0_i32 : i32, i32, i32
  }
}

</mosaic_0001>

<bundles_post_ra>
// kernel: vit_embedding_forward.1
= control target key start
LH: loop header
LB: loop body
LE: loop exit
PB: predicated region body
PF: predicated region fallthrough
CT: control target
= control target key end

     0   :  { %s553_s12 = smov 0   ;;  %s555_s13 = smov 0   ;;  %s607_s0 = inlined_call_operand.vmem [shape: bf16[2,17,64], index: 0, kind: input, shape index: {}]   ;;  %s608_s1 = inlined_call_operand.vmem [shape: bf16[64,32], index: 1, kind: input, shape index: {}]   ;;  %s609_s2 = inlined_call_operand.vmem [shape: f32[17,32], index: 2, kind: input, shape index: {}]   ;;  %s610_s3 = inlined_call_operand.vmem [shape: f32[2,17,32], index: 3, kind: output, shape index: {}]  }
   0x1   :  { %s557_s14 = smov 0  }
   0x2 LB: > { %s25_s15 = sadd.s32 1, %s527_s13  ;;  %p446_p0 = scmp.ge.s32.totalorder %s531_s14, 1  ;;  %s531_s14 = sphi %s557_s14, %s13_s14   ;;  %s527_s13 = sphi %s555_s13, %s612_s13   ;;  %s523_s12 = sphi %s553_s12, %s611_s12  }
   0x3   : > { %p27_p1 = scmp.ge.s32.totalorder %s25_s15, 2  ;;  %p169_p2 = scmp.lt.s32.totalorder %s531_s14, 3 }
   0x5   : > { %s614_s15 = smov (%p27_p1, %s25_s15), 0  ;;  %p170_p3 = pnand %p446_p0, %p169_p2 }
   0x6   : > { %v503_v0 = vld [vmem:[%s608_s1] sm:$0xff] (!%p170_p3)   ;;  %p207_p4 = scmp.lt.s32.totalorder (!%p170_p3), %s523_s12, 1  ;;  %v504_v1 = vld [vmem:[%s608_s1 + $0x8] sm:$0xff] (!%p170_p3)   ;;  %v505_v2 = vld [vmem:[%s608_s1 + $0x10] sm:$0xff] (!%p170_p3)   ;;  %vm279_vm0 = vcmask (!%p170_p3), 523264   ;;  %vm337_vm1 = vcmask (!%p170_p3), 253952  }
   0x7   : > { %173 = sbr.rel (%p170_p3) target bundleno = 241 (0xf1), region = 32  ;;  %465 = vmatprep.subr.bf16.mxu0 (!%p170_p3), %v503_v0  ;;  %v506_v3 = vld [vmem:[%s608_s1 + $0x18] sm:$0xff] (!%p170_p3)   ;;  %v246_v6 = vld [vmem:[%s609_s2 + $0x10] sm:$0x1] (!%p170_p3)  ;;  %v244_v7 = vld [vmem:[%s609_s2] sm:$0xff] (!%p170_p3)  ;;  %vm334_vm2 = vcmask (!%p170_p3), 261120  }
   0x8   : > { %466 = vmatpush3.bf16.msra.mxu0 (!%p170_p3), %v503_v0  ;;  %v245_v11 = vld [vmem:[%s609_s2 + $0x8] sm:$0xff] (!%p170_p3) }
   0x9   : > { %467 = vmatprep.subr.bf16.mxu0 (!%p170_p3), %v504_v1 }
   0xc   : > { %468 = vmatpush3.bf16.msra.mxu0 (!%p170_p3), %v504_v1 }
   0xd   : > { %469 = vmatprep.subr.bf16.mxu0 (!%p170_p3), %v505_v2 }
   0xe   : > { %s616_s12 = smov (!%p207_p4, %s523_s12), 1 }
   0xf   : > { %s477_s22 = smul.u32 12, %s616_s12 }
  0x10   : > { %470 = vmatpush3.bf16.msra.mxu0 %v505_v2  ;;  %s478_s28 = smul.u32 24, %s616_s12 }
  0x11   : > { %s214_s25 = scalar_lea.vmem %s607_s0, %s477_s22  ;;  %471 = vmatprep.subr.bf16.mxu0 %v506_v3 }
  0x12   : > { %v507_v4 = vld [vmem:[%s214_s25] sm:$0xff]   ;;  %v508_v5 = vld [vmem:[%s214_s25 + $0x8] ss:$0 sps:$4 sm:$0x11]   ;;  %s230_s8 = scalar_lea.vmem %s610_s3, %s478_s28 }
  0x13   : > { %473 = vmatprep.mubr.msk.bf16.mxu0 %vm279_vm0, %v507_v4 }
  0x14   : > { %472 = vmatpush3.bf16.msra.mxu0 %v506_v3 }
  0x17   : > { %474 = vmatmul.mubr.msk.bf16.vlgmr.msra.gmra.mrb[0].mxu0 %vm279_vm0, %v508_v5 }
  0xea   : > { %v475_v8 = vpop.f32.mrb[0].mxu0 }
  0xeb   : > { %v329_v9 = vadd.f32 %v475_v8, %v246_v6  ;;  %v320_v10 = vpop.f32.mrb[1].mxu0 }
  0xec   : > { %v321_v12 = vadd.f32 %v320_v10, %v244_v7  ;;  %v476_v13 = vpop.f32.mrb[2].mxu0 }
  0xed   : > { %338 = vst.msk [vmem:[%s230_s8 + $0x10] sm:$0x1] %vm337_vm1, %v329_v9  ;;  %v323_v14 = vpop.f32.mrb[3].mxu0 }
  0xee   : > { %335 = vst.msk [vmem:[%s230_s8] sm:$0xff] %vm334_vm2, %v321_v12  ;;  %v324_v15 = vadd.f32 %v323_v14, %v245_v11 }
  0xf0   : > { %336 = vst.msk [vmem:[%s230_s8 + $0x8] sm:$0xff] %vm334_vm2, %v324_v15 }
  0xf1 PF: > { %s13_s14 = sadd.s32 1, %s531_s14   ;;  %s611_s12 = smov %s527_s13 }
  0xf2   : > { %p10_p5 = scmp.ge.s32.totalorder %s13_s14, 4   ;;  %s612_s13 = smov %s614_s15 }
  0xf4   :  { %12 = sbr.rel (!%p10_p5) target bundleno = 2 (0x2), region = 65 }

</bundles_post_ra>
